<compile_context>
chip_gen: v7x
topology: tpu7x:2x2x1
jax: 0.10.0
libtpu: 0.0.40
codegen_flags: <defaults>
</compile_context>

<pallas_src>
import jax
import jax.numpy as jnp
from jax.experimental import pallas as pl
from jax.experimental.pallas import tpu as pltpu


def _make_coord_kernel(B, C, Cr, H, W):
    HW = H * W
    P = H + W

    def kernel(x_ref, w1_ref, sh_ref, whw_ref, pool_ref, eh_ref, ew_ref, o_ref):
        pool = pool_ref[...]                       # (HW, H+W) mean-pool matrix
        w1 = w1_ref[...]                           # (Cr, C), BN scale folded in
        sh = sh_ref[...]                           # (Cr, 1) BN shift
        w_hw = whw_ref[...]                        # (2C, Cr) = [F_h; F_w]
        eh = eh_ref[...]                           # (H, HW) 0/1 expansion
        ew = ew_ref[...]                           # (W, HW) 0/1 expansion

        x = x_ref[...].astype(jnp.float32)         # (B, C, HW)

        # Stage 0: coordinate mean-pooling as MXU matmuls (contraction = HW);
        # concatenate per-image results along the free axis so that stages
        # 1 and 2 become single batched GEMMs over B*(H+W) columns.
        x_pool = jnp.concatenate(
            [jnp.dot(x[b], pool, preferred_element_type=jnp.float32)
             for b in range(B)],
            axis=1)                                # (C, B*(H+W))

        # Stage 1: shared 1x1 conv + folded inference-BN + ReLU.  Applying it
        # to the pooled features directly is identical to the reference's
        # cat/conv/BN/relu/split because conv(1x1), BN (inference) and ReLU
        # act independently per spatial position.
        y = jnp.maximum(
            jnp.dot(w1, x_pool, preferred_element_type=jnp.float32) + sh,
            0.0)                                   # (Cr, B*(H+W))

        # Stage 2: F_h and F_w fused into a single (2C, Cr) matmul.
        logits = jnp.dot(w_hw, y, preferred_element_type=jnp.float32)  # (2C, B*(H+W))

        for b in range(B):
            lb = logits[:, b * P:(b + 1) * P]      # (2C, H+W)
            s_h = jax.nn.sigmoid(lb[:C, :H])       # (C, H)
            s_w = jax.nn.sigmoid(lb[C:, H:])       # (C, W)
            # Expand back to the lane-dense (C, H*W) layout with constant 0/1
            # matrices (MXU), then gate + residual + ReLU on full vregs.
            gate = (jnp.dot(s_h, eh, preferred_element_type=jnp.float32) *
                    jnp.dot(s_w, ew, preferred_element_type=jnp.float32))  # (C, HW)
            xb = x[b]
            o_ref[b] = jnp.maximum(xb * gate + xb, 0.0).astype(o_ref.dtype)

    return kernel


def _pick_batch_block(n, c, hw, itemsize):
    """Batch images per grid step: keep >=2 grid steps when possible (so the
    two v7x TensorCores both get work) while keeping the in+out block well
    inside VMEM (sized conservatively for the v7x 64 MiB / 32 MiB-scoped case)."""
    budget = 8 << 20                       # bytes of activation block (in+out)
    per_img = 2 * c * hw * itemsize
    cap = max(1, budget // max(per_img, 1))
    target = max(1, n // 2)
    b = max(1, min(target, cap, n))
    while n % b:
        b -= 1
    return max(b, 1)


def coord_layer_pallas(x, w1, bn_scale, bn_shift, w_h, w_w, *, batch_block=None):
    """x: (N, C, H, W); returns (N, C, H, W) with the same dtype as x.
    bn_scale/bn_shift are the folded inference-BN per-channel scale/shift."""
    N, C, H, W = x.shape
    Cr = w1.shape[0]
    HW = H * W

    # Fold the BN scale into the 1x1-conv weight (removes a VPU mul and one
    # padded (Cr,1) operand inside the kernel).
    w1f = (w1 * bn_scale.reshape(Cr, 1)).astype(jnp.float32)          # (Cr, C)
    sh = bn_shift.reshape(Cr, 1).astype(jnp.float32)                  # (Cr, 1)
    w_hw = jnp.concatenate([w_h, w_w], axis=0).astype(jnp.float32)    # (2C, Cr)

    # Constant pooling / expansion matrices for the lane-dense layout.
    h_idx = jnp.arange(HW, dtype=jnp.int32) // W
    w_idx = jnp.arange(HW, dtype=jnp.int32) % W
    eh = (h_idx[None, :] == jnp.arange(H, dtype=jnp.int32)[:, None]
          ).astype(jnp.float32)                                       # (H, HW)
    ew = (w_idx[None, :] == jnp.arange(W, dtype=jnp.int32)[:, None]
          ).astype(jnp.float32)                                       # (W, HW)
    pool = jnp.concatenate([eh.T / W, ew.T / H], axis=1)              # (HW, H+W)

    if batch_block is None:
        batch_block = _pick_batch_block(N, C, HW, jnp.dtype(x.dtype).itemsize)
    assert N % batch_block == 0
    grid = (N // batch_block,)

    x3 = x.reshape(N, C, HW)                       # free reshape (contiguous)
    kernel = _make_coord_kernel(batch_block, C, Cr, H, W)

    out3 = pl.pallas_call(
        kernel,
        out_shape=jax.ShapeDtypeStruct((N, C, HW), x.dtype),
        grid=grid,
        in_specs=[
            pl.BlockSpec((batch_block, C, HW), lambda b: (b, 0, 0)),
            pl.BlockSpec((Cr, C), lambda b: (0, 0)),
            pl.BlockSpec((Cr, 1), lambda b: (0, 0)),
            pl.BlockSpec((2 * C, Cr), lambda b: (0, 0)),
            pl.BlockSpec((HW, H + W), lambda b: (0, 0)),
            pl.BlockSpec((H, HW), lambda b: (0, 0)),
            pl.BlockSpec((W, HW), lambda b: (0, 0)),
        ],
        out_specs=pl.BlockSpec((batch_block, C, HW), lambda b: (b, 0, 0)),
        compiler_params=pltpu.CompilerParams(
            dimension_semantics=("parallel",)),
    )(x3, w1f, sh, w_hw, pool, eh, ew)
    return out3.reshape(N, C, H, W)


def coord_layer_ref(x, w1, gamma, beta, rmean, rvar, w_h, w_w, eps=1e-5):
    """Pure-JAX reference mirroring the PyTorch forward exactly
    (cat / 1x1 conv / BN(inference) / relu / split / F_h / F_w / gate)."""
    N, C, H, W = x.shape
    x_h = jnp.mean(x, axis=3, keepdims=True).transpose(0, 1, 3, 2)   # (N,C,1,H)
    x_w = jnp.mean(x, axis=2, keepdims=True)                         # (N,C,1,W)
    xc = jnp.concatenate([x_h, x_w], axis=3)                         # (N,C,1,H+W)
    y = jnp.einsum("oc,nchw->nohw", w1, xc)                          # 1x1 conv
    y = (y - rmean[None, :, None, None]) / jnp.sqrt(rvar[None, :, None, None] + eps)
    y = y * gamma[None, :, None, None] + beta[None, :, None, None]
    y = jnp.maximum(y, 0.0)
    y_h = y[:, :, :, :H].transpose(0, 1, 3, 2)                       # (N,Cr,H,1)
    y_w = y[:, :, :, H:]                                             # (N,Cr,1,W)
    s_h = jax.nn.sigmoid(jnp.einsum("oc,nchw->nohw", w_h, y_h))      # (N,C,H,1)
    s_w = jax.nn.sigmoid(jnp.einsum("oc,nchw->nohw", w_w, y_w))      # (N,C,1,W)
    out = x * s_h * s_w + x
    return jnp.maximum(out, 0.0)


if __name__ == "__main__":
    key = jax.random.PRNGKey(0)
    k_in, k_w1, k_wh, k_ww, k_g, k_b, k_m, k_v = jax.random.split(key, 8)

    # Five inputs of 16 channels each -> C = 80, Cr = C // 16 = 5.
    N, c_each, H, W = 2, 16, 16, 16
    xs = jax.random.normal(k_in, (5, N, c_each, H, W), dtype=jnp.float32)
    x1, x2, x3, x4, x5 = [xs[i] for i in range(5)]
    x = jnp.concatenate([x1, x2, x3, x4, x5], axis=1)                # (N, 80, H, W)
    C = x.shape[1]
    Cr = C // 16

    # Deterministic synthetic parameters (module __init__ shapes).
    w1 = 0.1 * jax.random.normal(k_w1, (Cr, C), dtype=jnp.float32)    # _1x1conv
    w_h = 0.1 * jax.random.normal(k_wh, (C, Cr), dtype=jnp.float32)   # F_h
    w_w = 0.1 * jax.random.normal(k_ww, (C, Cr), dtype=jnp.float32)   # F_w
    gamma = 1.0 + 0.1 * jax.random.normal(k_g, (Cr,), dtype=jnp.float32)
    beta = 0.1 * jax.random.normal(k_b, (Cr,), dtype=jnp.float32)
    rmean = 0.1 * jax.random.normal(k_m, (Cr,), dtype=jnp.float32)
    rvar = 0.5 + jax.random.uniform(k_v, (Cr,), dtype=jnp.float32)
    eps = 1e-5

    # Fold BN (inference) into scale/shift.
    bn_scale = (gamma / jnp.sqrt(rvar + eps)).reshape(Cr, 1)
    bn_shift = (beta - rmean * gamma / jnp.sqrt(rvar + eps)).reshape(Cr, 1)

    out = coord_layer_pallas(x, w1, bn_scale, bn_shift, w_h, w_w)
    out = jax.block_until_ready(out)

    ref = coord_layer_ref(x, w1, gamma, beta, rmean, rvar, w_h, w_w, eps)
    ref = jax.block_until_ready(ref)

    assert out.shape == (N, C, H, W)
    assert jnp.allclose(out, ref, atol=1e-4, rtol=1e-4), (
        float(jnp.max(jnp.abs(out - ref))))
    print("KERNEL_OK")
</pallas_src>

<mosaic_0001>
module attributes {stable_mosaic.version = 11 : i64} {
  func.func @kernel(%arg0: i32, %arg1: memref<1x80x256xf32, #tpu.memory_space<vmem>>, %arg2: memref<5x80xf32, #tpu.memory_space<vmem>>, %arg3: memref<5x1xf32, #tpu.memory_space<vmem>>, %arg4: memref<160x5xf32, #tpu.memory_space<vmem>>, %arg5: memref<256x32xf32, #tpu.memory_space<vmem>>, %arg6: memref<16x256xf32, #tpu.memory_space<vmem>>, %arg7: memref<16x256xf32, #tpu.memory_space<vmem>>, %arg8: memref<1x80x256xf32, #tpu.memory_space<vmem>>) attributes {dimension_semantics = [#tpu.dimension_semantics<parallel>], iteration_bounds = array<i64: 2>, scalar_prefetch = 0 : i64, scratch_operands = 0 : i64, tpu.core_type = #tpu.core_type<tc>, window_params = [{transform_indices = @transform_0, window_bounds = array<i64: 1, 80, 256>}, {pipeline_mode = #tpu.pipeline_mode<synchronous>, transform_indices = @transform_1, window_bounds = array<i64: 5, 80>}, {pipeline_mode = #tpu.pipeline_mode<synchronous>, transform_indices = @transform_2, window_bounds = array<i64: 5, 1>}, {pipeline_mode = #tpu.pipeline_mode<synchronous>, transform_indices = @transform_3, window_bounds = array<i64: 160, 5>}, {pipeline_mode = #tpu.pipeline_mode<synchronous>, transform_indices = @transform_4, window_bounds = array<i64: 256, 32>}, {pipeline_mode = #tpu.pipeline_mode<synchronous>, transform_indices = @transform_5, window_bounds = array<i64: 16, 256>}, {pipeline_mode = #tpu.pipeline_mode<synchronous>, transform_indices = @transform_6, window_bounds = array<i64: 16, 256>}, {transform_indices = @transform_7, window_bounds = array<i64: 1, 80, 256>}]} {
    %c0 = arith.constant 0 : index
    %c0_0 = arith.constant 0 : index
    %0 = vector.load %arg5[%c0, %c0_0] : memref<256x32xf32, #tpu.memory_space<vmem>>, vector<256x32xf32>
    %c0_1 = arith.constant 0 : index
    %c0_2 = arith.constant 0 : index
    %1 = vector.load %arg2[%c0_1, %c0_2] : memref<5x80xf32, #tpu.memory_space<vmem>>, vector<5x80xf32>
    %c0_3 = arith.constant 0 : index
    %c0_4 = arith.constant 0 : index
    %2 = vector.load %arg3[%c0_3, %c0_4] : memref<5x1xf32, #tpu.memory_space<vmem>>, vector<5x1xf32>
    %c0_5 = arith.constant 0 : index
    %c0_6 = arith.constant 0 : index
    %3 = vector.load %arg4[%c0_5, %c0_6] : memref<160x5xf32, #tpu.memory_space<vmem>>, vector<160x5xf32>
    %c0_7 = arith.constant 0 : index
    %c0_8 = arith.constant 0 : index
    %4 = vector.load %arg6[%c0_7, %c0_8] : memref<16x256xf32, #tpu.memory_space<vmem>>, vector<16x256xf32>
    %c0_9 = arith.constant 0 : index
    %c0_10 = arith.constant 0 : index
    %5 = vector.load %arg7[%c0_9, %c0_10] : memref<16x256xf32, #tpu.memory_space<vmem>>, vector<16x256xf32>
    %c0_11 = arith.constant 0 : index
    %c0_12 = arith.constant 0 : index
    %c0_13 = arith.constant 0 : index
    %6 = vector.load %arg1[%c0_11, %c0_12, %c0_13] : memref<1x80x256xf32, #tpu.memory_space<vmem>>, vector<1x80x256xf32>
    %7 = vector.shape_cast %6 : vector<1x80x256xf32> to vector<80x256xf32>
    %cst = arith.constant dense<0.000000e+00> : vector<80x32xf32>
    %8 = tpu.matmul %7, %0, %cst {dimension_numbers = #tpu.dot_dimension_numbers<[1], [0], [0], [1], [0, 0, 1, 1], [], []>} : vector<80x256xf32>, vector<256x32xf32>, vector<80x32xf32> -> vector<80x32xf32>
    %cst_14 = arith.constant dense<0.000000e+00> : vector<5x32xf32>
    %9 = tpu.matmul %1, %8, %cst_14 {dimension_numbers = #tpu.dot_dimension_numbers<[1], [0], [0], [1], [0, 0, 1, 1], [], []>} : vector<5x80xf32>, vector<80x32xf32>, vector<5x32xf32> -> vector<5x32xf32>
    %10 = vector.broadcast %2 : vector<5x1xf32> to vector<5x32xf32>
    %11 = arith.addf %9, %10 : vector<5x32xf32>
    %cst_15 = arith.constant 0.000000e+00 : f32
    %12 = vector.broadcast %cst_15 : f32 to vector<5x32xf32>
    %13 = arith.maximumf %11, %12 : vector<5x32xf32>
    %cst_16 = arith.constant dense<0.000000e+00> : vector<160x32xf32>
    %14 = tpu.matmul %3, %13, %cst_16 {dimension_numbers = #tpu.dot_dimension_numbers<[1], [0], [0], [1], [0, 0, 1, 1], [], []>} : vector<160x5xf32>, vector<5x32xf32>, vector<160x32xf32> -> vector<160x32xf32>
    %15 = vector.extract_strided_slice %14 {offsets = [0, 0], sizes = [80, 16], strides = [1, 1]} : vector<160x32xf32> to vector<80x16xf32>
    %16 = arith.negf %15 : vector<80x16xf32>
    %17 = math.exp %16 : vector<80x16xf32>
    %cst_17 = arith.constant 1.000000e+00 : f32
    %18 = vector.broadcast %cst_17 : f32 to vector<80x16xf32>
    %19 = arith.addf %18, %17 : vector<80x16xf32>
    %20 = arith.divf %18, %19 : vector<80x16xf32>
    %21 = vector.extract_strided_slice %14 {offsets = [80, 16], sizes = [80, 16], strides = [1, 1]} : vector<160x32xf32> to vector<80x16xf32>
    %22 = arith.negf %21 : vector<80x16xf32>
    %23 = math.exp %22 : vector<80x16xf32>
    %cst_18 = arith.constant 1.000000e+00 : f32
    %24 = vector.broadcast %cst_18 : f32 to vector<80x16xf32>
    %25 = arith.addf %24, %23 : vector<80x16xf32>
    %26 = arith.divf %24, %25 : vector<80x16xf32>
    %cst_19 = arith.constant dense<0.000000e+00> : vector<80x256xf32>
    %27 = tpu.matmul %20, %4, %cst_19 {dimension_numbers = #tpu.dot_dimension_numbers<[1], [0], [0], [1], [0, 0, 1, 1], [], []>} : vector<80x16xf32>, vector<16x256xf32>, vector<80x256xf32> -> vector<80x256xf32>
    %cst_20 = arith.constant dense<0.000000e+00> : vector<80x256xf32>
    %28 = tpu.matmul %26, %5, %cst_20 {dimension_numbers = #tpu.dot_dimension_numbers<[1], [0], [0], [1], [0, 0, 1, 1], [], []>} : vector<80x16xf32>, vector<16x256xf32>, vector<80x256xf32> -> vector<80x256xf32>
    %29 = arith.mulf %27, %28 : vector<80x256xf32>
    %30 = vector.shape_cast %6 : vector<1x80x256xf32> to vector<80x256xf32>
    %31 = arith.mulf %30, %29 : vector<80x256xf32>
    %32 = arith.addf %31, %30 : vector<80x256xf32>
    %cst_21 = arith.constant 0.000000e+00 : f32
    %33 = vector.broadcast %cst_21 : f32 to vector<80x256xf32>
    %34 = arith.maximumf %32, %33 : vector<80x256xf32>
    %c0_22 = arith.constant 0 : index
    %c0_23 = arith.constant 0 : index
    %c0_24 = arith.constant 0 : index
    %35 = vector.load %arg8[%c0_22, %c0_23, %c0_24] : memref<1x80x256xf32, #tpu.memory_space<vmem>>, vector<1x80x256xf32>
    %36 = vector.shape_cast %35 : vector<1x80x256xf32> to vector<80x256xf32>
    %37 = vector.shape_cast %34 : vector<80x256xf32> to vector<1x80x256xf32>
    tpu.vector_store %arg8[%c0_22, %c0_23, %c0_24], %37 {strides = array<i32>} : memref<1x80x256xf32, #tpu.memory_space<vmem>>, vector<1x80x256xf32>,
    return
  }
  func.func @transform_0(%arg0: i32) -> (i32, i32, i32) {
    %c0_i32 = arith.constant 0 : i32
    %c0_i32_0 = arith.constant 0 : i32
    %c0_i32_1 = arith.constant 0 : i32
    return %arg0, %c0_i32, %c0_i32_0 : i32, i32, i32
  }
  func.func @transform_1(%arg0: i32) -> (i32, i32) {
    %c0_i32 = arith.constant 0 : i32
    %c0_i32_0 = arith.constant 0 : i32
    %c0_i32_1 = arith.constant 0 : i32
    return %c0_i32, %c0_i32_0 : i32, i32
  }
  func.func @transform_2(%arg0: i32) -> (i32, i32) {
    %c0_i32 = arith.constant 0 : i32
    %c0_i32_0 = arith.constant 0 : i32
    %c0_i32_1 = arith.constant 0 : i32
    return %c0_i32, %c0_i32_0 : i32, i32
  }
  func.func @transform_3(%arg0: i32) -> (i32, i32) {
    %c0_i32 = arith.constant 0 : i32
    %c0_i32_0 = arith.constant 0 : i32
    %c0_i32_1 = arith.constant 0 : i32
    return %c0_i32, %c0_i32_0 : i32, i32
  }
  func.func @transform_4(%arg0: i32) -> (i32, i32) {
    %c0_i32 = arith.constant 0 : i32
    %c0_i32_0 = arith.constant 0 : i32
    %c0_i32_1 = arith.constant 0 : i32
    return %c0_i32, %c0_i32_0 : i32, i32
  }
  func.func @transform_5(%arg0: i32) -> (i32, i32) {
    %c0_i32 = arith.constant 0 : i32
    %c0_i32_0 = arith.constant 0 : i32
    %c0_i32_1 = arith.constant 0 : i32
    return %c0_i32, %c0_i32_0 : i32, i32
  }
  func.func @transform_6(%arg0: i32) -> (i32, i32) {
    %c0_i32 = arith.constant 0 : i32
    %c0_i32_0 = arith.constant 0 : i32
    %c0_i32_1 = arith.constant 0 : i32
    return %c0_i32, %c0_i32_0 : i32, i32
  }
  func.func @transform_7(%arg0: i32) -> (i32, i32, i32) {
    %c0_i32 = arith.constant 0 : i32
    %c0_i32_0 = arith.constant 0 : i32
    %c0_i32_1 = arith.constant 0 : i32
    return %arg0, %c0_i32, %c0_i32_0 : i32, i32, i32
  }
}

</mosaic_0001>

<bundles_post_ra>
// kernel: tpu_custom_call.1
= control target key start
LH: loop header
LB: loop body
LE: loop exit
PB: predicated region body
PF: predicated region fallthrough
CT: control target
= control target key end

     0   :  { %12 = vsyncpa [#allocation3], 0  ;;  %s2469_s0 = inlined_call_operand.vmem [shape: f32[2,80,256], index: 0, kind: input, shape index: {}]   ;;  %s2470_s1 = inlined_call_operand.vmem [shape: f32[5,80], index: 1, kind: input, shape index: {}]   ;;  %s2471_s2 = inlined_call_operand.vmem [shape: f32[5,1], index: 2, kind: input, shape index: {}]   ;;  %s2472_s3 = inlined_call_operand.vmem [shape: f32[160,5], index: 3, kind: input, shape index: {}]   ;;  %s2473_s4 = inlined_call_operand.vmem [shape: f32[256,32], index: 4, kind: input, shape index: {}]   ;;  %s2474_s5 = inlined_call_operand.vmem [shape: f32[16,256], index: 5, kind: input, shape index: {}]   ;;  %s2475_s6 = inlined_call_operand.vmem [shape: f32[16,256], index: 6, kind: input, shape index: {}]   ;;  %s2476_s7 = inlined_call_operand.hbm [shape: f32[2,80,256], index: 7, kind: output, shape index: {}]  }
   0x1   :  { %14 = vsyncpa [#allocation3 + $0x1], 0  ;;  %s1929_s24 = smov 0   ;;  %s1931_s25 = smov 0  }
   0x2   :  { %s1933_s26 = smov 0   ;;  %s1935_s27 = smov 0  }
   0x3 LB: > { %s1950_s28 = sadd.s32 4294967295, %s1879_s27   ;;  %s1411_s29 = sadd.s32 4294967294, %s1879_s27   ;;  %s1879_s27 = sphi %s1935_s27, %s2482_s27   ;;  %s1875_s26 = sphi %s1933_s26, %s2481_s26   ;;  %s1871_s25 = sphi %s1931_s25, %s2480_s25   ;;  %s1867_s24 = sphi %s1929_s24, %s2479_s24  }
   0x4   : > { %s1954_s30 = sadd.s32 1, %s1879_s27   ;;  %s179_s8 = sadd.s32 1, %s1875_s26 }
   0x5   : > { %s176_s9 = ssub.s32 %s1879_s27, %s1954_s30  ;;  %p189_p0 = scmp.ne.s32.totalorder %s1875_s26, %s1871_s25 }
   0x6   : > { %p177_p1 = scmp.eq.s32.totalorder %s176_s9, 0  ;;  %p190_p2 = scmp.eq.s32.totalorder %s1950_s28, 1 }
   0x7   : > { %p195_p3 = scmp.ne.s32.totalorder %s1871_s25, %s1867_s24  ;;  %p196_p4 = scmp.eq.s32.totalorder %s1411_s29, 1 }
   0x8   : > { %s1965_s10 = scalar_select %p177_p1, %s1875_s26, %s179_s8  }
   0x9   : > { %p1967_p5 = por %p190_p2, %p189_p0  ;;  %p1971_p6 = por %p196_p4, %p195_p3 }
   0xa   : > { %p1414_p7 = scmp.ge.s32.totalorder %s1879_s27, 1  ;;  %p240_p8 = scmp.lt.s32.totalorder %s1879_s27, 3 }
   0xc   : > { %p241_p9 = pnand %p1414_p7, %p240_p8 }
   0xd   : > { %v293_v0 = vld [vmem:[%s2473_s4 + $0x80] sm:$0xff] (!%p241_p9)  ;;  %v294_v1 = vld [vmem:[%s2473_s4 + $0x88] sm:$0xff] (!%p241_p9)  ;;  %p272_p10 = scmp.lt.s32.totalorder (!%p241_p9), %s1950_s28, 1  ;;  %v295_v5 = vld [vmem:[%s2473_s4 + $0x90] sm:$0xff] (!%p241_p9)  ;;  %vm1882_vm0 = vmmov (!%p241_p9), 0   ;;  %vm479_vm1 = vcmask (!%p241_p9), 654336  }
   0xe   : > { %244 = sbr.rel (%p241_p9) target bundleno = 1166 (0x48e), region = 48  ;;  %v277_v2 = vld [vmem:[%s2473_s4] sm:$0xff] (!%p241_p9)  ;;  %v1630_v3 = vpack.c.bf16 (!%p241_p9), %v294_v1, %v293_v0  ;;  %v278_v4 = vld [vmem:[%s2473_s4 + $0x8] sm:$0xff] (!%p241_p9)  ;;  %v296_v6 = vld [vmem:[%s2473_s4 + $0x98] sm:$0xff] (!%p241_p9)  ;;  %vm554_vm2 = vcmask (!%p241_p9), 39936   ;;  %vm615_vm3 = vcmask (!%p241_p9), 1044480  }
   0xf   : > { %v1632_v7 = vpack.c.bf16 (!%p241_p9), %v278_v4, %v277_v2  ;;  %v1634_v8 = vpack.c.bf16 (!%p241_p9), %v296_v6, %v295_v5  ;;  %v279_v9 = vld [vmem:[%s2473_s4 + $0x10] sm:$0xff] (!%p241_p9)  ;;  %v280_v10 = vld [vmem:[%s2473_s4 + $0x18] sm:$0xff] (!%p241_p9)  ;;  %v297_v11 = vld [vmem:[%s2473_s4 + $0xa0] sm:$0xff] (!%p241_p9)  ;;  %v1881_v4 = vmov (!%p241_p9), 0.0|0.0   ;;  %v1883_v5 = vmov (!%p241_p9), 0.0   ;;  %s1885_s18 = smov (!%p241_p9), 112  }
  0x10   : > { %1631 = vmatprep.subr.bf16.mxu0 (!%p241_p9), %v1630_v3  ;;  %v298_v12 = vld [vmem:[%s2473_s4 + $0xa8] sm:$0xff] (!%p241_p9)  ;;  %v1636_v13 = vpack.c.bf16 (!%p241_p9), %v280_v10, %v279_v9  ;;  %v281_v15 = vld [vmem:[%s2473_s4 + $0x20] sm:$0xff] (!%p241_p9)  ;;  %v299_v17 = vld [vmem:[%s2473_s4 + $0xb0] sm:$0xff] (!%p241_p9)  ;;  %1662 = vmatprep.subr.bf16.mxu1 (!%p241_p9), %v1881_v4  ;;  %vm904_vm4 = vcmask (!%p241_p9), 130048   ;;  %s269_s19 = sand.u32 (!%p241_p9), 1, %s1871_s25   ;;  %s1689_s23 = smul.u32 (!%p241_p9), 2560, %s1950_s28 }
  0x11   : > { %1633 = vmatpush3.bf16.msra.mxu0 (!%p241_p9), %v1632_v7  ;;  %v1638_v14 = vpack.c.bf16 (!%p241_p9), %v298_v12, %v297_v11  ;;  %v282_v16 = vld [vmem:[%s2473_s4 + $0x28] sm:$0xff] (!%p241_p9)  ;;  %v300_v18 = vld [vmem:[%s2473_s4 + $0xb8] sm:$0xff] (!%p241_p9)  ;;  %v283_v21 = vld [vmem:[%s2473_s4 + $0x30] sm:$0xff] (!%p241_p9)  ;;  %1595 = vmatprep.mubr.msk.f32.mxu1 (!%p241_p9), %vm1882_vm0, %v1883_v5  ;;  %v1884_v7 = vmov (!%p241_p9), 0   ;;  %s1687_s21 = smul.u32 (!%p241_p9), 160, %s269_s19  ;;  %s1886_s14 = smov (!%p241_p9), [#allocation2]  }
  0x12   : > { %1635 = vmatprep.subr.bf16.mxu0 (!%p241_p9), %v1634_v8  ;;  %v1640_v19 = vpack.c.bf16 (!%p241_p9), %v282_v16, %v281_v15  ;;  %v1642_v20 = vpack.c.bf16 (!%p241_p9), %v300_v18, %v299_v17  ;;  %v284_v22 = vld [vmem:[%s2473_s4 + $0x38] sm:$0xff] (!%p241_p9)  ;;  %v301_v23 = vld [vmem:[%s2473_s4 + $0xc0] sm:$0xff] (!%p241_p9)  ;;  %v302_v24 = vld [vmem:[%s2473_s4 + $0xc8] sm:$0xff] (!%p241_p9)  ;;  %1736 = vset.pattern.permute.xlu0 (!%p241_p9), %v1884_v7  ;;  %s2420_s9 = scalar_lea.hbm (!%p241_p9), %s2476_s7, %s1689_s23  ;;  %s1821_s15 = sshll.u32 (!%p241_p9), %s1886_s14, 4  ;;  %s1822_s15 = int_to_ptr.vmem [resolvable:$false] %s1821_s15 }
  0x13   : > { %v1644_v26 = vpack.c.bf16 (!%p241_p9), %v284_v22, %v283_v21  ;;  %v1646_v27 = vpack.c.bf16 (!%p241_p9), %v302_v24, %v301_v23  ;;  %v285_v28 = vld [vmem:[%s2473_s4 + $0x40] sm:$0xff] (!%p241_p9)  ;;  %v286_v29 = vld [vmem:[%s2473_s4 + $0x48] sm:$0xff] (!%p241_p9)  ;;  %v303_v30 = vld [vmem:[%s2473_s4 + $0xd0] sm:$0xff] (!%p241_p9)  ;;  %s2352_s22 = scalar_lea.vmem (!%p241_p9), [#allocation2], %s1687_s21 }
  0x14   : > { %v304_v31 = vld [vmem:[%s2473_s4 + $0xd8] sm:$0xff] (!%p241_p9)  ;;  %v1648_v32 = vpack.c.bf16 (!%p241_p9), %v286_v29, %v285_v28  ;;  %v287_v34 = vld [vmem:[%s2473_s4 + $0x50] sm:$0xff] (!%p241_p9)  ;;  %v305_v36 = vld [vmem:[%s2473_s4 + $0xe0] sm:$0xff] (!%p241_p9)  ;;  %s1349_s29 = sshll.u32 (!%p241_p9), %s2352_s22, 4  ;;  %s2422_s29 = int_to_ptr.vmem [resolvable:$true] %s1349_s29 }
  0x15   : > { %s273_s17 = scalar_select %p272_p10, %s1950_s28, 1  ;;  %1637 = vmatpush3.bf16.msra.mxu0 %v1636_v13  ;;  %v1650_v33 = vpack.c.bf16 %v304_v31, %v303_v30  ;;  %v288_v35 = vld [vmem:[%s2473_s4 + $0x58] sm:$0xff]  ;;  %v306_v37 = vld [vmem:[%s2473_s4 + $0xe8] sm:$0xff]  ;;  %v289_v40 = vld [vmem:[%s2473_s4 + $0x60] sm:$0xff] }
  0x16   : > { %1639 = vmatprep.subr.bf16.mxu0 %v1638_v14  ;;  %v1652_v38 = vpack.c.bf16 %v288_v35, %v287_v34  ;;  %v1654_v39 = vpack.c.bf16 %v306_v37, %v305_v36  ;;  %v290_v41 = vld [vmem:[%s2473_s4 + $0x68] sm:$0xff]  ;;  %v307_v42 = vld [vmem:[%s2473_s4 + $0xf0] sm:$0xff]  ;;  %v308_v43 = vld [vmem:[%s2473_s4 + $0xf8] sm:$0xff]  ;;  %s2428_s28 = scalar_lea.sflag [#allocation3], %s269_s19  ;;  %s1817_s13 = scalar_lea.vmem %s2422_s29, 2560 }
  0x17   : > { %s1688_s20 = smul.u32 160, %s273_s17  ;;  %v1656_v44 = vpack.c.bf16 %v290_v41, %v289_v40  ;;  %v1658_v45 = vpack.c.bf16 %v308_v43, %v307_v42  ;;  %v291_v46 = vld [vmem:[%s2473_s4 + $0x70] sm:$0xff]  ;;  %v292_v47 = vld [vmem:[%s2473_s4 + $0x78] sm:$0xff]  ;;  %v310_v6 = vld [vmem:[%s2471_s2] sm:$0x1f]  ;;  %p1818_p11 = scmp.ne.s32.totalorder %s2422_s29, %s1817_s13 }
  0x18   : > { %v1660_v48 = vpack.c.bf16 %v292_v47, %v291_v46  ;;  %476 = vperm.xlu0 %1736, %v310_v6   ;;  %v312_v7 = vld [vmem:[%s2472_s3 + $0x8] sm:$0xff]  ;;  %p1824_p0 = scmp.lt.s32.totalorder %s2422_s29, %s1822_s15 }
  0x19   : > { %s2024_s17 = scalar_lea.vmem %s2469_s0, %s1688_s20  ;;  %1641 = vmatpush3.bf16.msra.mxu0 %v1640_v19  ;;  %p1819_p12 = pnand %p1818_p11, %p1967_p5 }
  0x1a   : > { %v2039_v25 = vld [vmem:[%s2024_s17 + $0x8] sm:$0xff]  ;;  %1643 = vmatprep.subr.bf16.mxu0 %v1642_v20  ;;  %v2085_v49 = vld [vmem:[%s2024_s17] sm:$0xff]  ;;  %v2088_v50 = vld [vmem:[%s2024_s17 + $0x18] sm:$0xff] }
  0x1b   : > { %423 = vmatprep.mubr.f32.mxu0 %v2039_v25  ;;  %v2093_v51 = vld [vmem:[%s2024_s17 + $0x10] sm:$0xff]  ;;  %v2096_v52 = vld [vmem:[%s2024_s17 + $0x28] sm:$0xff]  ;;  %v2101_v53 = vld [vmem:[%s2024_s17 + $0x20] sm:$0xff]  ;;  %p1820_p13 = pneg %p1819_p12 }
  0x1c   : > { %v2104_v54 = vld [vmem:[%s2024_s17 + $0x38] sm:$0xff]  ;;  %v2109_v55 = vld [vmem:[%s2024_s17 + $0x30] sm:$0xff]  ;;  %v2112_v56 = vld [vmem:[%s2024_s17 + $0x48] sm:$0xff] }
  0x1d   : > { %1645 = vmatpush3.bf16.msra.mxu0 %v1644_v26  ;;  %v2117_v57 = vld [vmem:[%s2024_s17 + $0x40] sm:$0xff]  ;;  %v2120_v58 = vld [vmem:[%s2024_s17 + $0x58] sm:$0xff]  ;;  %v2125_v59 = vld [vmem:[%s2024_s17 + $0x50] sm:$0xff] }
  0x1e   : > { %1647 = vmatprep.subr.bf16.mxu0 %v1646_v27  ;;  %v2128_v60 = vld [vmem:[%s2024_s17 + $0x68] sm:$0xff]  ;;  %v2133_v61 = vld [vmem:[%s2024_s17 + $0x60] sm:$0xff]  ;;  %v2136_v62 = vld [vmem:[%s2024_s17 + $0x78] sm:$0xff] }
  0x1f   : > { %v2141_v63 = vld [vmem:[%s2024_s17 + $0x70] sm:$0xff]  ;;  %v2144_v0 = vld [vmem:[%s2024_s17 + $0x88] sm:$0xff]  ;;  %v2149_v1 = vld [vmem:[%s2024_s17 + $0x80] sm:$0xff] }
  0x20   : > { %v2152_v2 = vld [vmem:[%s2024_s17 + $0x98] sm:$0xff]  ;;  %v2157_v3 = vld [vmem:[%s2024_s17 + $0x90] sm:$0xff]  ;;  %s1823_s17 = scalar_lea.vmem %s1822_s15, 5120 }
  0x21   : > { %1649 = vmatpush3.bf16.msra.mxu0 %v1648_v32  ;;  %p1825_p1 = scmp.lt.s32.totalorder %s1823_s17, %s1817_s13 }
  0x22   : > { %1651 = vmatprep.subr.bf16.mxu0 %v1650_v33 }
  0x23   : > { %p1826_p2 = por %p1825_p1, %p1824_p0 }
  0x25   : > { %1653 = vmatpush3.bf16.msra.mxu0 %v1652_v38  ;;  %p1827_p3 = pnand %p1826_p2, %p1820_p13 }
  0x26   : > { %1655 = vmatprep.subr.bf16.mxu0 %v1654_v39 }
  0x29   : > { %1657 = vmatpush3.bf16.msra.mxu0 %v1656_v44  ;;  %v309_v44 = vld [vmem:[%s2470_s1] sm:$0x1f] }
  0x2a   : > { %1659 = vmatprep.subr.bf16.mxu0 %v1658_v45  ;;  %v311_v45 = vld [vmem:[%s2472_s3] sm:$0xff] }
  0x2d   : > { %1661 = vmatpush3.bf16.msra.mxu0 %v1660_v48 }
  0x30   : > { %424 = vmatmul.mubr.f32.vlgmr.msra.gmra.mrb[0].mxu0 %v2085_v49 }
  0x31   : > { %428 = vmatprep.mubr.f32.mxu0 %v2088_v50 }
  0x34   : > { %429 = vmatmul.mubr.f32.gmra.mrb[2].mxu0 %v2093_v51 }
  0x35   : > { %433 = vmatprep.mubr.f32.mxu0 %v2096_v52 }
  0x38   : > { %434 = vmatmul.mubr.f32.gmra.mrb[4].mxu0 %v2101_v53 }
  0x39   : > { %438 = vmatprep.mubr.f32.mxu0 %v2104_v54 }
  0x3c   : > { %439 = vmatmul.mubr.f32.gmra.mrb[6].mxu0 %v2109_v55 }
  0x3d   : > { %443 = vmatprep.mubr.f32.mxu0 %v2112_v56 }
  0x40   : > { %444 = vmatmul.mubr.f32.gmra.mrb[8].mxu0 %v2117_v57 }
  0x41   : > { %448 = vmatprep.mubr.f32.mxu0 %v2120_v58 }
  0x44   : > { %449 = vmatmul.mubr.f32.gmra.mrb[10].mxu0 %v2125_v59 }
  0x45   : > { %453 = vmatprep.mubr.f32.mxu0 %v2128_v60 }
  0x48   : > { %454 = vmatmul.mubr.f32.gmra.mrb[12].mxu0 %v2133_v61 }
  0x49   : > { %458 = vmatprep.mubr.f32.mxu0 %v2136_v62 }
  0x4c   : > { %459 = vmatmul.mubr.f32.gmra.mrb[14].mxu0 %v2141_v63 }
  0x4d   : > { %463 = vmatprep.mubr.f32.mxu0 %v2144_v0 }
  0x50   : > { %464 = vmatmul.mubr.f32.gmra.mrb[16].mxu0 %v2149_v1 }
  0x51   : > { %468 = vmatprep.mubr.f32.mxu0 %v2152_v2 }
  0x54   : > { %469 = vmatmul.mubr.f32.gmra.mrb[18].mxu0 %v2157_v3 }
  0x55   : > { %1174 = vmatprep.mubr.f32.mxu0 %v1883_v5 }
  0x97   : > { %v477_v46 = vpop.permute.xlu0 %476 }
 0x103   : > { %v1513_v8 = vpop.f32.mrb[0].mxu0 }
 0x104   : > { %v1514_v9 = vpop.f32.mrb[1].mxu0 }
 0x105   : > { %v1515_v10 = vadd.f32 %v1514_v9, %v1513_v8  ;;  %v313_v8 = vld [vmem:[%s2472_s3 + $0x10] sm:$0xff]  ;;  %v314_v9 = vld [vmem:[%s2472_s3 + $0x18] sm:$0xff] }
 0x107   : > { %v1516_v11 = vpop.f32.mrb[2].mxu0 }
 0x108   : > { %v1517_v12 = vpop.f32.mrb[3].mxu0 }
 0x109   : > { %v1518_v13 = vadd.f32 %v1517_v12, %v1516_v11  ;;  %v316_v11 = vld [vmem:[%s2472_s3 + $0x28] sm:$0xff]  ;;  %v317_v12 = vld [vmem:[%s2472_s3 + $0x30] sm:$0xff] }
 0x10b   : > { %v1519_v14 = vpop.f32.mrb[4].mxu0  ;;  %v1663_v15 = vpack.c.bf16 %v1518_v13, %v1515_v10  ;;  %v315_v10 = vld [vmem:[%s2472_s3 + $0x20] sm:$0xff]  ;;  %v318_v13 = vld [vmem:[%s2472_s3 + $0x38] sm:$0xff] }
 0x10c   : > { %v1520_v16 = vpop.f32.mrb[5].mxu0 }
 0x10d   : > { %v1521_v17 = vadd.f32 %v1520_v16, %v1519_v14  ;;  %1664 = vmatpush3.bf16.msra.mxu1 %v1663_v15  ;;  %v319_v14 = vld [vmem:[%s2472_s3 + $0x40] sm:$0xff]  ;;  %v320_v15 = vld [vmem:[%s2472_s3 + $0x48] sm:$0xff]  ;;  %v321_v16 = vld [vmem:[%s2472_s3 + $0x50] sm:$0xff] }
 0x10e   : > { %1665 = vmatprep.subr.bf16.mxu1 %v1881_v4 }
 0x10f   : > { %v1522_v18 = vpop.f32.mrb[6].mxu0 }
 0x110   : > { %v1523_v19 = vpop.f32.mrb[7].mxu0 }
 0x111   : > { %v1524_v20 = vadd.f32 %v1523_v19, %v1522_v18  ;;  %v323_v18 = vld [vmem:[%s2472_s3 + $0x60] sm:$0xff]  ;;  %v324_v19 = vld [vmem:[%s2472_s3 + $0x68] sm:$0xff] }
 0x113   : > { %v1666_v21 = vpack.c.bf16 %v1524_v20, %v1521_v17  ;;  %v1525_v22 = vpop.f32.mrb[8].mxu0  ;;  %v322_v17 = vld [vmem:[%s2472_s3 + $0x58] sm:$0xff]  ;;  %v325_v20 = vld [vmem:[%s2472_s3 + $0x70] sm:$0xff] }
 0x114   : > { %v1526_v23 = vpop.f32.mrb[9].mxu0 }
 0x115   : > { %v1527_v24 = vadd.f32 %v1526_v23, %v1525_v22  ;;  %1667 = vmatpush3.bf16.msra.mxu1 %v1666_v21  ;;  %v326_v21 = vld [vmem:[%s2472_s3 + $0x78] sm:$0xff]  ;;  %v327_v22 = vld [vmem:[%s2472_s3 + $0x80] sm:$0xff]  ;;  %v328_v23 = vld [vmem:[%s2472_s3 + $0x88] sm:$0xff] }
 0x116   : > { %1668 = vmatprep.subr.bf16.mxu1 %v1881_v4 }
 0x117   : > { %v1528_v26 = vpop.f32.mrb[10].mxu0 }
 0x118   : > { %v1529_v27 = vpop.f32.mrb[11].mxu0 }
 0x119   : > { %v1530_v28 = vadd.f32 %v1529_v27, %v1528_v26  ;;  %v330_v26 = vld [vmem:[%s2472_s3 + $0x98] sm:$0xff]  ;;  %v332_v27 = vld [vmem:[%s2474_s5 + $0x8] sm:$0xff] }
 0x11b   : > { %v1669_v29 = vpack.c.bf16 %v1530_v28, %v1527_v24  ;;  %v1531_v30 = vpop.f32.mrb[12].mxu0  ;;  %v329_v24 = vld [vmem:[%s2472_s3 + $0x90] sm:$0xff]  ;;  %v334_v28 = vld [vmem:[%s2474_s5 + $0x18] sm:$0xff] }
 0x11c   : > { %v1532_v31 = vpop.f32.mrb[13].mxu0 }
 0x11d   : > { %v1533_v32 = vadd.f32 %v1532_v31, %v1531_v30  ;;  %1670 = vmatpush3.bf16.msra.mxu1 %v1669_v29  ;;  %v1677_v29 = vpack.c.bf16 %v334_v28, %v332_v27  ;;  %v331_v30 = vld [vmem:[%s2474_s5] sm:$0xff]  ;;  %v333_v31 = vld [vmem:[%s2474_s5 + $0x10] sm:$0xff] }
 0x11e   : > { %1671 = vmatprep.subr.bf16.mxu1 %v1881_v4 }
 0x11f   : > { %v1534_v33 = vpop.f32.mrb[14].mxu0 }
 0x120   : > { %v1535_v34 = vpop.f32.mrb[15].mxu0 }
 0x121   : > { %v1536_v35 = vadd.f32 %v1535_v34, %v1534_v33  ;;  %v336_v33 = vld [vmem:[%s2475_s6 + $0x8] sm:$0xff]  ;;  %v338_v34 = vld [vmem:[%s2475_s6 + $0x18] sm:$0xff] }
 0x123   : > { %v1672_v36 = vpack.c.bf16 %v1536_v35, %v1533_v32  ;;  %v1537_v37 = vpop.f32.mrb[16].mxu0  ;;  %v1679_v32 = vpack.c.bf16 %v333_v31, %v331_v30  ;;  %v335_v35 = vld [vmem:[%s2475_s6] sm:$0xff] }
 0x124   : > { %v1538_v38 = vpop.f32.mrb[17].mxu0 }
 0x125   : > { %v1539_v39 = vadd.f32 %v1538_v38, %v1537_v37  ;;  %1673 = vmatpush3.bf16.msra.mxu1 %v1672_v36  ;;  %v1681_v36 = vpack.c.bf16 %v338_v34, %v336_v33  ;;  %v337_v37 = vld [vmem:[%s2475_s6 + $0x10] sm:$0xff] }
 0x126   : > { %1674 = vmatprep.subr.bf16.mxu1 %v1881_v4  ;;  %v2273_v38 = vpack.c.bf16 %v337_v37, %v335_v35 }
 0x127   : > { %v1540_v40 = vpop.f32.mrb[18].mxu0  ;;  %1682 = vmatprep.subr.bf16.mxu0 %v1681_v36 }
 0x128   : > { %v1541_v41 = vpop.f32.mrb[19].mxu0  ;;  %1684 = vmatpush1.bf16.msra.mxu0 %v2273_v38 }
 0x129   : > { %v1542_v42 = vadd.f32 %v1541_v41, %v1540_v40 }
 0x12b   : > { %v1675_v43 = vpack.c.bf16 %v1542_v42, %v1539_v39 }
 0x12d   : > { %1676 = vmatpush3.bf16.msra.mxu1 %v1675_v43 }
 0x130   : > { %1596 = vmatmul.mubr.msk.f32.vlgmr.msra.gmra.mrb[0].mxu1 %vm479_vm1, %v309_v44 }
 0x131   : > { %1600 = vmatprep.mubr.msk.f32.mxu1 %vm554_vm2, %v311_v45 }
 0x203   : > { %v549_v47 = vpop.f32.mrb[0].mxu1 }
 0x204   : > { %v550_v48 = vadd.f32 %v549_v47, %v477_v46  ;;  %v1597_v4 = vpop.f32.mrb[1].mxu1 }
 0x206   : > { %v553_v6 = vmax.f32 %v550_v48, 0.0 }
 0x208   : > { %1598 = vmatprep.subr.msk.mxu1 %vm615_vm3, %v553_v6 }
 0x209   : > { %1599 = vmatpush3.msk.msra.mxu1 %vm615_vm3, %v553_v6 }
 0x20a   : > { %1601 = vmatmul.mubr.msk.f32.vlgmr.msra.gmra.mrb[2].mxu1 %vm554_vm2, %v312_v7  ;;  %1678 = vmatprep.subr.bf16.mxu1 %v1677_v29 }
 0x20b   : > { %1603 = vmatprep.mubr.msk.f32.mxu1 %vm554_vm2, %v313_v8  ;;  %1680 = vmatpush1.bf16.msra.mxu1 %v1679_v32 }
 0x20c   : > { %1685 = vmatprep.subr.bf16.mxu1 %v1681_v36 }
 0x20e   : > { %1604 = vmatmul.mubr.msk.f32.gmra.mrb[4].mxu1 %vm554_vm2, %v314_v9 }
 0x20f   : > { %1606 = vmatprep.mubr.msk.f32.mxu1 %vm554_vm2, %v315_v10 }
 0x212   : > { %1607 = vmatmul.mubr.msk.f32.gmra.mrb[6].mxu1 %vm554_vm2, %v316_v11 }
 0x213   : > { %1609 = vmatprep.mubr.msk.f32.mxu1 %vm554_vm2, %v317_v12 }
 0x216   : > { %1610 = vmatmul.mubr.msk.f32.gmra.mrb[8].mxu1 %vm554_vm2, %v318_v13 }
 0x217   : > { %1612 = vmatprep.mubr.msk.f32.mxu1 %vm554_vm2, %v319_v14 }
 0x21a   : > { %1613 = vmatmul.mubr.msk.f32.gmra.mrb[10].mxu1 %vm554_vm2, %v320_v15 }
 0x21b   : > { %1615 = vmatprep.mubr.msk.f32.mxu1 %vm554_vm2, %v321_v16 }
 0x21e   : > { %1616 = vmatmul.mubr.msk.f32.gmra.mrb[12].mxu1 %vm554_vm2, %v322_v17 }
 0x21f   : > { %1618 = vmatprep.mubr.msk.f32.mxu1 %vm554_vm2, %v323_v18 }
 0x222   : > { %1619 = vmatmul.mubr.msk.f32.gmra.mrb[14].mxu1 %vm554_vm2, %v324_v19 }
 0x223   : > { %1621 = vmatprep.mubr.msk.f32.mxu1 %vm554_vm2, %v325_v20 }
 0x226   : > { %1622 = vmatmul.mubr.msk.f32.gmra.mrb[16].mxu1 %vm554_vm2, %v326_v21 }
 0x227   : > { %1624 = vmatprep.mubr.msk.f32.mxu1 %vm554_vm2, %v327_v22 }
 0x22a   : > { %1625 = vmatmul.mubr.msk.f32.gmra.mrb[18].mxu1 %vm554_vm2, %v328_v23 }
 0x22b   : > { %1627 = vmatprep.mubr.msk.f32.mxu1 %vm554_vm2, %v329_v24 }
 0x22e   : > { %1628 = vmatmul.mubr.msk.f32.gmra.mrb[20].mxu1 %vm554_vm2, %v330_v26 }
 0x22f   : > { %999 = vmatprep.mubr.f32.mxu1 %v1883_v5 }
 0x2dd   : > { %v1602_v39 = vpop.f32.mrb[2].mxu1 }
 0x2de   : > { %v1439_v40 = vmul.f32 -1.442695, %v1602_v39  ;;  %v685_v41 = vpop.f32.mrb[3].mxu1 }
 0x2df   : > { %v1438_v42 = vmul.f32 -1.442695, %v685_v41 }
 0x2e0   : > { %1737 = vpow2.f32 %v1439_v40 }
 0x2e1   : > { %1739 = vpow2.f32 %v1438_v42  ;;  %v1605_v43 = vpop.f32.mrb[4].mxu1 }
 0x2e2   : > { %v695_v44 = vpop.f32.mrb[5].mxu1  ;;  %v1441_v46 = vmul.f32 -1.442695, %v1605_v43 }
 0x2e3   : > { %v1440_v45 = vmul.f32 -1.442695, %v695_v44 }
 0x2e5   : > { %1741 = vpow2.f32 %v1440_v45  ;;  %v1608_v47 = vpop.f32.mrb[6].mxu1 }
 0x2e6   : > { %v705_v48 = vpop.f32.mrb[7].mxu1  ;;  %v1443_v4 = vmul.f32 -1.442695, %v1608_v47  ;;  %1743 = vpow2.f32 %v1441_v46 }
 0x2e7   : > { %v1442_v6 = vmul.f32 -1.442695, %v705_v48 }
 0x2e8   : > { %1745 = vpow2.f32 %v1443_v4 }
 0x2e9   : > { %v1611_v7 = vpop.f32.mrb[8].mxu1  ;;  %1747 = vpow2.f32 %v1442_v6 }
 0x2ea   : > { %v1738_v8 = vpop.eup %1737  ;;  %v715_v9 = vpop.f32.mrb[9].mxu1  ;;  %v1445_v17 = vmul.f32 -1.442695, %v1611_v7 }
 0x2eb   : > { %v1740_v10 = vpop.eup %1739  ;;  %v1444_v11 = vmul.f32 -1.442695, %v715_v9  ;;  %v815_v14 = vadd.f32 1.0, %v1738_v8 }
 0x2ec   : > { %v814_v12 = vadd.f32 1.0, %v1740_v10 }
 0x2ed   : > { %v1614_v13 = vpop.f32.mrb[10].mxu1 }
 0x2ee   : > { %1749 = vrcp.f32 %v814_v12  ;;  %v725_v15 = vpop.f32.mrb[11].mxu1  ;;  %v1447_v18 = vmul.f32 -1.442695, %v1614_v13 }
 0x2ef   : > { %v1742_v16 = vpop.eup %1741  ;;  %1751 = vpow2.f32 %v1444_v11  ;;  %v1446_v32 = vmul.f32 -1.442695, %v725_v15 }
 0x2f0   : > { %v1744_v20 = vpop.eup %1743  ;;  %1753 = vrcp.f32 %v815_v14  ;;  %v816_v21 = vadd.f32 1.0, %v1742_v16 }
 0x2f1   : > { %v1617_v19 = vpop.f32.mrb[12].mxu1  ;;  %1755 = vpow2.f32 %v1445_v17  ;;  %v817_v27 = vadd.f32 1.0, %v1744_v20 }
 0x2f2   : > { %v1449_v22 = vmul.f32 -1.442695, %v1617_v19  ;;  %v735_v23 = vpop.f32.mrb[13].mxu1  ;;  %v1746_v26 = vpop.eup %1745 }
 0x2f3   : > { %v1448_v24 = vmul.f32 -1.442695, %v735_v23  ;;  %v1748_v29 = vpop.eup %1747  ;;  %v819_v35 = vadd.f32 1.0, %v1746_v26 }
 0x2f4   : > { %1757 = vpow2.f32 %v1449_v22  ;;  %v818_v37 = vadd.f32 1.0, %v1748_v29 }
 0x2f5   : > { %1759 = vpow2.f32 %v1447_v18  ;;  %v1620_v28 = vpop.f32.mrb[14].mxu1 }
 0x2f6   : > { %1761 = vrcp.f32 %v816_v21  ;;  %v1451_v30 = vmul.f32 -1.442695, %v1620_v28  ;;  %v745_v31 = vpop.f32.mrb[15].mxu1 }
 0x2f7   : > { %1763 = vpow2.f32 %v1448_v24  ;;  %v1450_v33 = vmul.f32 -1.442695, %v745_v31 }
 0x2f8   : > { %v1750_v34 = vpop.eup %1749  ;;  %1765 = vpow2.f32 %v1451_v30 }
 0x2f9   : > { %v1752_v36 = vpop.eup %1751  ;;  %1767 = vrcp.f32 %v817_v27  ;;  %1458 = vmatmul.mubr.msk.f32.vlgmr.msra.gmra.mrb[22].mxu1 %vm904_vm4, %v1750_v34  ;;  %v1623_v39 = vpop.f32.mrb[16].mxu1 }
 0x2fa   : > { %1769 = vpow2.f32 %v1450_v33  ;;  %v1453_v40 = vmul.f32 -1.442695, %v1623_v39  ;;  %1005 = vmatprep.mubr.f32.mxu1 %v1883_v5  ;;  %v755_v41 = vpop.f32.mrb[17].mxu1  ;;  %1686 = vmatpush1.bf16.msra.mxu1 %v2273_v38  ;;  %v1754_v43 = vpop.eup %1753  ;;  %v820_v44 = vadd.f32 1.0, %v1752_v36 }
 0x2fb   : > { %1771 = vpow2.f32 %v1446_v32  ;;  %v1452_v42 = vmul.f32 -1.442695, %v755_v41  ;;  %v1756_v45 = vpop.eup %1755 }
 0x2fc   : > { %1773 = vrcp.f32 %v819_v35  ;;  %v821_v22 = vadd.f32 1.0, %v1756_v45 }
 0x2fd   : > { %1775 = vrcp.f32 %v818_v37  ;;  %1459 = vmatmul.mubr.msk.f32.gmra.mrb[24].mxu1 %vm904_vm4, %v1754_v43  ;;  %v1626_v46 = vpop.f32.mrb[18].mxu1 }
 0x2fe   : > { %v1758_v47 = vpop.eup %1757  ;;  %1777 = vpow2.f32 %v1453_v40  ;;  %v1455_v48 = vmul.f32 -1.442695, %v1626_v46  ;;  %1011 = vmatprep.mubr.f32.mxu1 %v1883_v5  ;;  %v765_v4 = vpop.f32.mrb[19].mxu1 }
 0x2ff   : > { %v1760_v6 = vpop.eup %1759  ;;  %v875_v7 = vadd.f32 1.0, %v1758_v47  ;;  %1779 = vpow2.f32 %v1452_v42  ;;  %v1454_v38 = vmul.f32 -1.442695, %v765_v4 }
 0x300   : > { %v1762_v8 = vpop.eup %1761  ;;  %1781 = vrcp.f32 %v820_v44  ;;  %v823_v36 = vadd.f32 1.0, %v1760_v6 }
 0x301   : > { %v1764_v9 = vpop.eup %1763  ;;  %1783 = vrcp.f32 %v875_v7  ;;  %1460 = vmatmul.mubr.msk.f32.gmra.mrb[26].mxu1 %vm904_vm4, %v1762_v8  ;;  %v1629_v10 = vpop.f32.mrb[20].mxu1 }
 0x302   : > { %v1766_v11 = vpop.eup %1765  ;;  %v874_v12 = vadd.f32 1.0, %v1764_v9  ;;  %1785 = vpow2.f32 %v1455_v48  ;;  %v1457_v13 = vmul.f32 -1.442695, %v1629_v10  ;;  %1017 = vmatprep.mubr.f32.mxu1 %v1883_v5  ;;  %v775_v14 = vpop.f32.mrb[21].mxu1 }
 0x303   : > { %v1768_v15 = vpop.eup %1767  ;;  %v877_v16 = vadd.f32 1.0, %v1766_v11  ;;  %1787 = vpow2.f32 %v1454_v38  ;;  %v1456_v18 = vmul.f32 -1.442695, %v775_v14 }
 0x304   : > { %v1770_v17 = vpop.eup %1769  ;;  %1789 = vrcp.f32 %v874_v12 }
 0x305   : > { %v1772_v19 = vpop.eup %1771  ;;  %1791 = vrcp.f32 %v877_v16  ;;  %v876_v20 = vadd.f32 1.0, %v1770_v17  ;;  %1461 = vmatmul.mubr.msk.f32.gmra.mrb[28].mxu1 %vm904_vm4, %v1768_v15 }
 0x306   : > { %v1774_v21 = vpop.eup %1773  ;;  %1793 = vpow2.f32 %v1457_v13  ;;  %1023 = vmatprep.mubr.f32.mxu1 %v1883_v5  ;;  %v822_v29 = vadd.f32 1.0, %v1772_v19 }
 0x307   : > { %v1776_v23 = vpop.eup %1775  ;;  %1795 = vrcp.f32 %v876_v20 }
 0x308   : > { %v1778_v24 = vpop.eup %1777  ;;  %1797 = vpow2.f32 %v1456_v18 }
 0x309   : > { %v1780_v26 = vpop.eup %1779  ;;  %v879_v27 = vadd.f32 1.0, %v1778_v24  ;;  %1462 = vmatmul.mubr.msk.f32.gmra.mrb[30].mxu1 %vm904_vm4, %v1776_v23  ;;  %1799 = vrcp.f32 %v821_v22 }
 0x30a   : > { %v1782_v28 = vpop.eup %1781  ;;  %v878_v30 = vadd.f32 1.0, %v1780_v26  ;;  %1029 = vmatprep.mubr.f32.mxu1 %v1883_v5 }
 0x30b   : > { %v1784_v31 = vpop.eup %1783  ;;  %1801 = vrcp.f32 %v879_v27 }
 0x30c   : > { %v1786_v32 = vpop.eup %1785  ;;  %1803 = vrcp.f32 %v878_v30  ;;  %1072 = vrot.lane.b32.xlu1 %v1784_v31, %s1885_s18 }
 0x30d   : > { %v1788_v33 = vpop.eup %1787  ;;  %v881_v34 = vadd.f32 1.0, %v1786_v32  ;;  %1463 = vmatmul.mubr.msk.f32.gmra.mrb[32].mxu1 %vm904_vm4, %v1774_v21  ;;  %1805 = vrcp.f32 %v822_v29 }
 0x30e   : > { %v1790_v35 = vpop.eup %1789  ;;  %v880_v37 = vadd.f32 1.0, %v1788_v33  ;;  %1035 = vmatprep.mubr.f32.mxu1 %v1883_v5 }
 0x30f   : > { %v1792_v39 = vpop.eup %1791  ;;  %1807 = vrcp.f32 %v881_v34  ;;  %1070 = vrot.lane.b32.xlu0 %v1790_v35, %s1885_s18 }
 0x310   : > { %v1794_v40 = vpop.eup %1793  ;;  %1809 = vrcp.f32 %v880_v37 }
 0x311   : > { %v1796_v41 = vpop.eup %1795  ;;  %v883_v42 = vadd.f32 1.0, %v1794_v40  ;;  %1464 = vmatmul.mubr.msk.f32.gmra.mrb[34].mxu1 %vm904_vm4, %v1782_v28  ;;  %1811 = vrcp.f32 %v823_v36 }
 0x312   : > { %v1798_v43 = vpop.eup %1797  ;;  %1041 = vmatprep.mubr.f32.mxu1 %v1883_v5  ;;  %1074 = vrot.lane.b32.xlu1 %v1796_v41, %s1885_s18 }
 0x313   : > { %1813 = vrcp.f32 %v883_v42  ;;  %1076 = vrot.lane.b32.xlu0 %v1792_v39, %s1885_s18  ;;  %v882_v44 = vadd.f32 1.0, %v1798_v43  ;;  %v1800_v45 = vpop.eup %1799 }
 0x315   : > { %v1802_v46 = vpop.eup %1801  ;;  %1815 = vrcp.f32 %v882_v44  ;;  %1465 = vmatmul.mubr.msk.f32.gmra.mrb[36].mxu1 %vm904_vm4, %v1800_v45 }
 0x316   : > { %v1804_v47 = vpop.eup %1803  ;;  %1047 = vmatprep.mubr.f32.mxu1 %v1883_v5 }
 0x317   : > { %1080 = vrot.lane.b32.xlu0 %v1802_v46, %s1885_s18  ;;  %1078 = vrot.lane.b32.xlu1 %v1804_v47, %s1885_s18  ;;  %v1806_v48 = vpop.eup %1805 }
 0x319   : > { %v1808_v4 = vpop.eup %1807  ;;  %1466 = vmatmul.mubr.msk.f32.gmra.mrb[38].mxu1 %vm904_vm4, %v1806_v48 }
 0x31a   : > { %v1810_v6 = vpop.eup %1809  ;;  %1053 = vmatprep.mubr.f32.mxu1 %v1883_v5 }
 0x31b   : > { %1084 = vrot.lane.b32.xlu0 %v1808_v4, %s1885_s18  ;;  %1082 = vrot.lane.b32.xlu1 %v1810_v6, %s1885_s18  ;;  %v1812_v7 = vpop.eup %1811 }
 0x31d   : > { %v1814_v38 = vpop.eup %1813  ;;  %1467 = vmatmul.mubr.msk.f32.gmra.mrb[40].mxu1 %vm904_vm4, %v1812_v7 }
 0x31e   : > { %1228 = vmatprep.mubr.f32.mxu1 %v1883_v5 }
 0x31f   : > { %v1816_v8 = vpop.eup %1815  ;;  %1088 = vrot.lane.b32.xlu0 %v1814_v38, %s1885_s18 }
 0x320   : > { %1086 = vrot.lane.b32.xlu1 %v1816_v8, %s1885_s18 }
 0x37e   : > { %v1073_v10 = vpop.permute.xlu1 %1072 }
 0x381   : > { %v1071_v9 = vpop.permute.xlu0 %1070 }
 0x382   : > { %1468 = vmatmul.mubr.msk.f32.vlgmr.msra.gmra.mrb[20].mxu0 %vm904_vm4, %v1071_v9 }
 0x383   : > { %1180 = vmatprep.mubr.f32.mxu0 %v1883_v5 }
 0x384   : > { %v1075_v12 = vpop.permute.xlu1 %1074 }
 0x385   : > { %v1077_v11 = vpop.permute.xlu0 %1076 }
 0x386   : > { %1469 = vmatmul.mubr.msk.f32.gmra.mrb[22].mxu0 %vm904_vm4, %v1073_v10 }
 0x387   : > { %1186 = vmatprep.mubr.f32.mxu0 %v1883_v5 }
 0x389   : > { %v1081_v13 = vpop.permute.xlu0 %1080  ;;  %v1079_v15 = vpop.permute.xlu1 %1078 }
 0x38a   : > { %1470 = vmatmul.mubr.msk.f32.gmra.mrb[24].mxu0 %vm904_vm4, %v1075_v12 }
 0x38b   : > { %1192 = vmatprep.mubr.f32.mxu0 %v1883_v5 }
 0x38d   : > { %v1085_v14 = vpop.permute.xlu0 %1084  ;;  %v1083_v17 = vpop.permute.xlu1 %1082 }
 0x38e   : > { %1471 = vmatmul.mubr.msk.f32.gmra.mrb[26].mxu0 %vm904_vm4, %v1077_v11 }
 0x38f   : > { %1198 = vmatprep.mubr.f32.mxu0 %v1883_v5 }
 0x391   : > { %v1089_v16 = vpop.permute.xlu0 %1088 }
 0x392   : > { %1472 = vmatmul.mubr.msk.f32.gmra.mrb[28].mxu0 %vm904_vm4, %v1079_v15  ;;  %1477 = vmatmul.mubr.msk.f32.vlgmr.msra.gmra.mrb[42].mxu1 %vm904_vm4, %v1089_v16  ;;  %v1087_v18 = vpop.permute.xlu1 %1086 }
 0x393   : > { %1204 = vmatprep.mubr.f32.mxu0 %v1883_v5 }
 0x396   : > { %1473 = vmatmul.mubr.msk.f32.gmra.mrb[30].mxu0 %vm904_vm4, %v1081_v13 }
 0x397   : > { %1210 = vmatprep.mubr.f32.mxu0 %v1883_v5 }
 0x39a   : > { %1474 = vmatmul.mubr.msk.f32.gmra.mrb[32].mxu0 %vm904_vm4, %v1083_v17 }
 0x39b   : > { %1216 = vmatprep.mubr.f32.mxu0 %v1883_v5 }
 0x39e   : > { %1475 = vmatmul.mubr.msk.f32.gmra.mrb[34].mxu0 %vm904_vm4, %v1085_v14 }
 0x39f   : > { %1222 = vmatprep.mubr.f32.mxu0 %v1883_v5 }
 0x3a2   : > { %1476 = vmatmul.mubr.msk.f32.gmra.mrb[36].mxu0 %vm904_vm4, %v1087_v18 }
 0x3cc   : > { %v1001_v19 = vpop.f32.mrb[22].mxu1 }
 0x3cd   : > { %v1003_v20 = vpop.f32.mrb[23].mxu1 }
 0x3d0   : > { %v1007_v21 = vpop.f32.mrb[24].mxu1 }
 0x3d1   : > { %v1009_v22 = vpop.f32.mrb[25].mxu1 }
 0x3d4   : > { %v1013_v23 = vpop.f32.mrb[26].mxu1 }
 0x3d5   : > { %v1015_v24 = vpop.f32.mrb[27].mxu1 }
 0x3d8   : > { %v1019_v26 = vpop.f32.mrb[28].mxu1 }
 0x3d9   : > { %v1021_v27 = vpop.f32.mrb[29].mxu1 }
 0x3dc   : > { %v1025_v28 = vpop.f32.mrb[30].mxu1 }
 0x3dd   : > { %v2325_v29 = vpop.f32.mrb[31].mxu1 }
 0x3e0   : > { %v2327_v30 = vpop.f32.mrb[32].mxu1 }
 0x3e1   : > { %v2329_v31 = vpop.f32.mrb[33].mxu1 }
 0x3e4   : > { %v2331_v5 = vpop.f32.mrb[34].mxu1 }
 0x3e5   : > { %v2333_v32 = vpop.f32.mrb[35].mxu1 }
 0x3e8   : > { %v2335_v33 = vpop.f32.mrb[36].mxu1 }
 0x3e9   : > { %v2337_v34 = vpop.f32.mrb[37].mxu1 }
 0x3ec   : > { %v2339_v35 = vpop.f32.mrb[38].mxu1 }
 0x3ed   : > { %v2341_v36 = vpop.f32.mrb[39].mxu1 }
 0x3f0   : > { %v1055_v37 = vpop.f32.mrb[40].mxu1 }
 0x3f1   : > { %v1057_v39 = vpop.f32.mrb[41].mxu1 }
 0x455   : > { %v1176_v40 = vpop.f32.mrb[20].mxu0 }
 0x456   : > { %v1235_v41 = vmul.f32 %v1176_v40, %v1001_v19  ;;  %v1178_v42 = vpop.f32.mrb[21].mxu0 }
 0x457   : > { %v1236_v43 = vmul.f32 %v1178_v42, %v1003_v20 }
 0x458   : > { %v1255_v44 = vmul.f32 %v1235_v41, %v2085_v49 }
 0x459   : > { %v1256_v45 = vmul.f32 %v1236_v43, %v2039_v25  ;;  %v1182_v46 = vpop.f32.mrb[22].mxu0 }
 0x45a   : > { %v1275_v47 = vadd.f32 %v1255_v44, %v2085_v49  ;;  %v1237_v48 = vmul.f32 %v1182_v46, %v1007_v21  ;;  %v1184_v4 = vpop.f32.mrb[23].mxu0 }
 0x45b   : > { %v1276_v6 = vadd.f32 %v1256_v45, %v2039_v25  ;;  %v1238_v7 = vmul.f32 %v1184_v4, %v1009_v22 }
 0x45c   : > { %v1295_v38 = vmax.f32 %v1275_v47, 0.0  ;;  %v1257_v8 = vmul.f32 %v1237_v48, %v2093_v51 }
 0x45d   : > { %v1296_v9 = vmax.f32 %v1276_v6, 0.0  ;;  %v1258_v10 = vmul.f32 %v1238_v7, %v2088_v50  ;;  %v1188_v11 = vpop.f32.mrb[24].mxu0 }
 0x45e   : > { %1315 = vst [vmem:[%s2352_s22] sm:$0xff] %v1295_v38  ;;  %v1277_v49 = vadd.f32 %v1257_v8, %v2093_v51  ;;  %v1239_v12 = vmul.f32 %v1188_v11, %v1013_v23  ;;  %v1190_v13 = vpop.f32.mrb[25].mxu0 }
 0x45f   : > { %1316 = vst [vmem:[%s2352_s22 + $0x8] sm:$0xff] %v1296_v9  ;;  %v1278_v25 = vadd.f32 %v1258_v10, %v2088_v50  ;;  %v1240_v14 = vmul.f32 %v1190_v13, %v1015_v24 }
 0x460   : > { %v1297_v15 = vmax.f32 %v1277_v49, 0.0  ;;  %v1259_v16 = vmul.f32 %v1239_v12, %v2101_v53 }
 0x461   : > { %v1298_v17 = vmax.f32 %v1278_v25, 0.0  ;;  %v1260_v18 = vmul.f32 %v1240_v14, %v2096_v52  ;;  %v1194_v19 = vpop.f32.mrb[26].mxu0 }
 0x462   : > { %1317 = vst [vmem:[%s2352_s22 + $0x10] sm:$0xff] %v1297_v15  ;;  %v1279_v20 = vadd.f32 %v1259_v16, %v2101_v53  ;;  %v1241_v21 = vmul.f32 %v1194_v19, %v1019_v26  ;;  %v1196_v22 = vpop.f32.mrb[27].mxu0 }
 0x463   : > { %1318 = vst [vmem:[%s2352_s22 + $0x18] sm:$0xff] %v1298_v17  ;;  %v1280_v51 = vadd.f32 %v1260_v18, %v2096_v52  ;;  %v1242_v23 = vmul.f32 %v1196_v22, %v1021_v27 }
 0x464   : > { %v1299_v50 = vmax.f32 %v1279_v20, 0.0  ;;  %v1261_v24 = vmul.f32 %v1241_v21, %v2109_v55 }
 0x465   : > { %v1300_v40 = vmax.f32 %v1280_v51, 0.0  ;;  %v1262_v41 = vmul.f32 %v1242_v23, %v2104_v54  ;;  %v1200_v42 = vpop.f32.mrb[28].mxu0  ;;  %v1230_v43 = vpop.f32.mrb[42].mxu1 }
 0x466   : > { %1319 = vst [vmem:[%s2352_s22 + $0x20] sm:$0xff] %v1299_v50  ;;  %v1281_v44 = vadd.f32 %v1261_v24, %v2109_v55  ;;  %v1243_v53 = vmul.f32 %v1200_v42, %v1025_v28  ;;  %v1253_v26 = vmul.f32 %v1230_v43, %v1055_v37  ;;  %v1202_v45 = vpop.f32.mrb[29].mxu0  ;;  %v1232_v46 = vpop.f32.mrb[43].mxu1 }
 0x467   : > { %1320 = vst [vmem:[%s2352_s22 + $0x28] sm:$0xff] %v1300_v40  ;;  %v1282_v52 = vadd.f32 %v1262_v41, %v2104_v54  ;;  %v1244_v27 = vmul.f32 %v1202_v45, %v2325_v29  ;;  %v1254_v47 = vmul.f32 %v1232_v46, %v1057_v39 }
 0x468   : > { %v1301_v48 = vmax.f32 %v1281_v44, 0.0  ;;  %v1263_v4 = vmul.f32 %v1243_v53, %v2117_v57  ;;  %v1273_v6 = vmul.f32 %v1253_v26, %v2157_v3 }
 0x469   : > { %v1302_v7 = vmax.f32 %v1282_v52, 0.0  ;;  %v1264_v55 = vmul.f32 %v1244_v27, %v2112_v56  ;;  %v1274_v28 = vmul.f32 %v1254_v47, %v2152_v2  ;;  %v1206_v37 = vpop.f32.mrb[30].mxu0 }
 0x46a   : > { %1321 = vst [vmem:[%s2352_s22 + $0x30] sm:$0xff] %v1301_v48  ;;  %v1283_v38 = vadd.f32 %v1263_v4, %v2117_v57  ;;  %v1293_v54 = vadd.f32 %v1273_v6, %v2157_v3  ;;  %v1245_v29 = vmul.f32 %v1206_v37, %v2327_v30  ;;  %v1208_v39 = vpop.f32.mrb[31].mxu0 }
 0x46b   : > { %1322 = vst [vmem:[%s2352_s22 + $0x38] sm:$0xff] %v1302_v7  ;;  %v1284_v8 = vadd.f32 %v1264_v55, %v2112_v56  ;;  %v1294_v9 = vadd.f32 %v1274_v28, %v2152_v2  ;;  %v1246_v10 = vmul.f32 %v1208_v39, %v2329_v31 }
 0x46c   : > { %v1303_v11 = vmax.f32 %v1283_v38, 0.0  ;;  %v1313_v49 = vmax.f32 %v1293_v54, 0.0  ;;  %v1265_v12 = vmul.f32 %v1245_v29, %v2125_v59 }
 0x46d   : > { %v1304_v57 = vmax.f32 %v1284_v8, 0.0  ;;  %v1314_v13 = vmax.f32 %v1294_v9, 0.0  ;;  %v1266_v3 = vmul.f32 %v1246_v10, %v2120_v58  ;;  %v1212_v30 = vpop.f32.mrb[32].mxu0 }
 0x46e   : > { %1323 = vst [vmem:[%s2352_s22 + $0x40] sm:$0xff] %v1303_v11  ;;  %1333 = vst [vmem:[%s2352_s22 + $0x90] sm:$0xff] %v1313_v49  ;;  %v1285_v25 = vadd.f32 %v1265_v12, %v2125_v59  ;;  %v1247_v56 = vmul.f32 %v1212_v30, %v2331_v5  ;;  %v1214_v2 = vpop.f32.mrb[33].mxu0 }
 0x46f   : > { %1324 = vst [vmem:[%s2352_s22 + $0x48] sm:$0xff] %v1304_v57  ;;  %1334 = vst [vmem:[%s2352_s22 + $0x98] sm:$0xff] %v1314_v13  ;;  %v1286_v31 = vadd.f32 %v1266_v3, %v2120_v58  ;;  %v1248_v14 = vmul.f32 %v1214_v2, %v2333_v32 }
 0x470   : > { %v1305_v15 = vmax.f32 %v1285_v25, 0.0  ;;  %v1267_v16 = vmul.f32 %v1247_v56, %v2133_v61 }
 0x471   : > { %v1306_v17 = vmax.f32 %v1286_v31, 0.0  ;;  %v1268_v18 = vmul.f32 %v1248_v14, %v2128_v60  ;;  %v1218_v19 = vpop.f32.mrb[34].mxu0 }
 0x472   : > { %1325 = vst [vmem:[%s2352_s22 + $0x50] sm:$0xff] %v1305_v15  ;;  %v1287_v59 = vadd.f32 %v1267_v16, %v2133_v61  ;;  %v1249_v5 = vmul.f32 %v1218_v19, %v2335_v33  ;;  %v1220_v20 = vpop.f32.mrb[35].mxu0 }
 0x473   : > { %1326 = vst [vmem:[%s2352_s22 + $0x58] sm:$0xff] %v1306_v17  ;;  %v1288_v58 = vadd.f32 %v1268_v18, %v2128_v60  ;;  %v1250_v32 = vmul.f32 %v1220_v20, %v2337_v34 }
 0x474   : > { %v1307_v21 = vmax.f32 %v1287_v59, 0.0  ;;  %v1269_v22 = vmul.f32 %v1249_v5, %v2141_v63 }
 0x475   : > { %v1308_v51 = vmax.f32 %v1288_v58, 0.0  ;;  %v1270_v23 = vmul.f32 %v1250_v32, %v2136_v62  ;;  %v1224_v50 = vpop.f32.mrb[36].mxu0 }
 0x476   : > { %1327 = vst [vmem:[%s2352_s22 + $0x60] sm:$0xff] %v1307_v21  ;;  %v1289_v61 = vadd.f32 %v1269_v22, %v2141_v63  ;;  %v1251_v33 = vmul.f32 %v1224_v50, %v2339_v35  ;;  %v1226_v24 = vpop.f32.mrb[37].mxu0 }
 0x477   : > { %1328 = vst [vmem:[%s2352_s22 + $0x68] sm:$0xff] %v1308_v51  ;;  %v1290_v60 = vadd.f32 %v1270_v23, %v2136_v62  ;;  %v1252_v34 = vmul.f32 %v1226_v24, %v2341_v36 }
 0x478   : > { %v1309_v40 = vmax.f32 %v1289_v61, 0.0  ;;  %v1271_v41 = vmul.f32 %v1251_v33, %v2149_v1 }
 0x479   : > { %v1310_v42 = vmax.f32 %v1290_v60, 0.0  ;;  %v1272_v43 = vmul.f32 %v1252_v34, %v2144_v0 }
 0x47a   : > { %1329 = vst [vmem:[%s2352_s22 + $0x70] sm:$0xff] %v1309_v40  ;;  %v1291_v63 = vadd.f32 %v1271_v41, %v2149_v1 }
 0x47b   : > { %1330 = vst [vmem:[%s2352_s22 + $0x78] sm:$0xff] %v1310_v42  ;;  %v1292_v62 = vadd.f32 %v1272_v43, %v2144_v0 }
 0x47c   : > { %v1311_v35 = vmax.f32 %v1291_v63, 0.0 }
 0x47d   : > { %v1312_v36 = vmax.f32 %v1292_v62, 0.0 }
 0x47e   : > { %1331 = vst [vmem:[%s2352_s22 + $0x80] sm:$0xff] %v1311_v35 }
 0x47f   : > { %1332 = vst [vmem:[%s2352_s22 + $0x88] sm:$0xff] %v1312_v36 }
 0x480   : > { %1830 = shalt.err (!%p1827_p3)
}
 0x481   : > { %s1831_s16 = scalar_lea.hbm %s2420_s9, 2560  ;;  %s1835_s21 = scalar_lea.hbm %s2476_s7, 5120 }
 0x482   : > { %p1832_p4 = scmp.ne.s32.totalorder %s2420_s9, %s1831_s16  ;;  %p1836_p9 = scmp.lt.u32.totalorder %s2420_s9, %s2476_s7 }
 0x483   : > { %p1837_p10 = scmp.lt.u32.totalorder %s1835_s21, %s1831_s16  ;;  %p1839_p12 = scmp.lt.u32.totalorder %s1831_s16, %s2420_s9 }
 0x484   : > { %p1833_p7 = pnand %p1832_p4, %p1967_p5 }
 0x485   : > { %p1838_p11 = por %p1837_p10, %p1836_p9 }
 0x486   : > { %p1834_p8 = pneg %p1833_p7 }
 0x487   : > { %p1840_p13 = por %p1839_p12, %p1838_p11 }
 0x489   : > { %p1841_p0 = pnand %p1840_p13, %p1834_p8 }
 0x48b   : > { %1844 = shalt.err (!%p1841_p0)
}
 0x48c   : > { %s1887_s8 = smov 256   ;;  %s1888_s20 = smov 16  }
 0x48d   : > { %1690 = dma.vmem_to_hbm [thread:$0]  (%p1967_p5), %s2422_s29, 2560, %s2420_s9, %s2428_s28, %s1887_s8, %s1887_s8, %s1888_s20  }
 0x48e PF: > { %p1696_p1 = scmp.ge.s32.totalorder %s1879_s27, 2  ;;  %s1364_s13 = sand.u32 1, %s1867_s24  }
 0x48f   : > { %s1365_s14 = scalar_lea.sflag [#allocation3], %s1364_s13 }
 0x490   : > { %p1693_p2 = pnand %p1696_p1, %p1971_p6 }
 0x492   : > { %1862 = dma.done.wait (!%p1693_p2), %s1365_s14, 2560  }
 0x493   : > { %1864 = vsyncadd (!%p1693_p2), %s1365_s14, 4294964736  ;;  %p17_p3 = scmp.ge.s32.totalorder %s1954_s30, 4   ;;  %s2479_s24 = smov %s1871_s25 }
 0x494   : > { %s2480_s25 = smov %s1875_s26  ;;  %s2481_s26 = smov %s1965_s10 }
 0x495   : > { %s2482_s27 = smov %s1954_s30  ;;  %19 = sbr.rel (!%p17_p3) target bundleno = 3 (0x3), region = 83 }
 0x49c   :  { %1370 = vsyncpa [#allocation3], 1 }
 0x49d   :  { %1372 = vsyncpa [#allocation3 + $0x1], 1 }

</bundles_post_ra>
